<compile_context>
chip_gen: v7x
topology: tpu7x:2x2x1
jax: 0.10.0
libtpu: 0.0.40
codegen_flags: <defaults>
</compile_context>

<pallas_src>
import math

import jax
import jax.numpy as jnp
from jax.experimental import pallas as pl
from jax.experimental.pallas import tpu as pltpu


def _gaussian_taps_1d(size, sigma):
    """Normalized 1-D Gaussian taps as Python floats (compile-time constants)."""
    mean = (size - 1) / 2.0
    taps = [math.exp(-(((i - mean) / sigma) ** 2) / 2.0) for i in range(int(size))]
    total = sum(taps)
    return tuple(t / total for t in taps)


def make_gaussian_weight(kernel_size, sigma, channels=1):
    """(C, 1, K, K) buffer identical to GaussianSmoothing.__init__ (used by the reference)."""
    if isinstance(kernel_size, (int, float)):
        kernel_size = [int(kernel_size)] * 2
    if isinstance(sigma, (int, float)):
        sigma = [float(sigma)] * 2
    grids = jnp.meshgrid(
        *[jnp.arange(s, dtype=jnp.float32) for s in kernel_size], indexing="ij"
    )
    kernel = jnp.ones((), dtype=jnp.float32)
    for size, std, mgrid in zip(kernel_size, sigma, grids):
        mean = (size - 1) / 2.0
        kernel = kernel * (
            1.0 / (std * math.sqrt(2.0 * math.pi))
            * jnp.exp(-(((mgrid - mean) / std) ** 2) / 2.0)
        )
    kernel = kernel / jnp.sum(kernel)
    kernel = kernel.reshape(1, 1, *kernel.shape)
    return jnp.tile(kernel, (channels, 1, 1, 1))


def _vmem_capacity_bytes():
    """Physical VMEM per TensorCore; conservative (v7x = 64 MiB) fallback."""
    try:
        v = int(getattr(pltpu.get_tpu_info(), "vmem_capacity_bytes", 0))
        if v > 0:
            return v
    except Exception:
        pass
    return 64 * 1024 * 1024


def _num_tensorcores():
    """TensorCores per chip (megacore detection); fall back to 1 (single-TC behaviour)."""
    try:
        info = pltpu.get_tpu_info()
        for name in ("num_cores", "core_count", "num_tensorcores", "tensor_cores_per_chip"):
            v = getattr(info, name, None)
            if v:
                return max(1, int(v))
    except Exception:
        pass
    try:
        v = getattr(jax.devices()[0], "num_cores", None)
        if v:
            return max(1, int(v))
    except Exception:
        pass
    return 1


def _choose_p_blk(p, cap, num_cores):
    """Planes per grid step: largest clean divisor under the VMEM-derived cap,
    with megacore-aware step-count shaping and a ragged-block fallback."""
    cap = max(1, min(int(cap), p))
    if num_cores > 1:
        # Keep at least `num_cores` grid steps so the megacore can split the grid.
        cap = min(cap, max(1, -(-p // num_cores)))
    div = 1
    for d in range(1, cap + 1):
        if p % d == 0:
            div = d
    p_blk = div
    if div * 2 <= cap:
        # Poor divisor (prime-ish N*C): accept a ragged last block instead of tiny tiles.
        p_blk = cap
    if num_cores > 1:
        steps = -(-p // p_blk)
        if steps > 1 and steps % num_cores:
            # Prefer a step count that is a multiple of the core count (no idle-TC tail step).
            target = -(-steps // num_cores) * num_cores
            cand = max(1, -(-p // target))
            if -(-p // cand) % num_cores == 0:
                p_blk = cand
    return p_blk


def _make_blur_kernel(w_v, w_h, pad, h, w, h_out, w_out, with_pad_scratch):
    """Kernel body for one (P_blk, H, W) block with baked separable taps.

    Vertical taps: sublane-offset reads straight from the (pad-scratch or input) ref,
    f32 accumulation with two independent partials (VALU ILP).
    Horizontal taps: pltpu.roll on the XLU + one final valid-window lane slice.
    """
    kv, kh = len(w_v), len(w_h)

    def kernel(x_ref, o_ref, *scratch):
        if with_pad_scratch:
            pad_ref = scratch[0]
            # Build the zero halo in VMEM (no HBM pad pass).  Re-zero every step: the
            # grid may be sharded across TensorCores, so a "first step only" init is unsafe.
            pad_ref[...] = jnp.zeros(pad_ref.shape, pad_ref.dtype)
            pad_ref[:, pad:pad + h, pad:pad + w] = x_ref[...]
            src = pad_ref
        else:
            src = x_ref

        # ---- Vertical pass: per-tap sublane-offset reads from the ref, f32 accumulate.
        parts = [None, None]
        for i in range(kv):
            term = w_v[i] * src[:, i:i + h_out, :].astype(jnp.float32)
            s = i & 1
            parts[s] = term if parts[s] is None else parts[s] + term
        tmp = parts[0] if parts[1] is None else parts[0] + parts[1]  # (P_blk, H_out, W_pad) f32

        # ---- Horizontal pass: lane shifts on the XLU; wrapped columns land in
        # [w_out, w_pad) and are removed by the final slice.
        width = tmp.shape[-1]
        parts = [None, None]
        for j in range(kh):
            shifted = tmp if j == 0 else pltpu.roll(tmp, shift=(width - j) % width, axis=2)
            term = w_h[j] * shifted
            s = j & 1
            parts[s] = term if parts[s] is None else parts[s] + term
        acc = parts[0] if parts[1] is None else parts[0] + parts[1]   # (P_blk, H_out, W_pad)

        o_ref[...] = acc[:, :, :w_out].astype(o_ref.dtype)

    return kernel


def gaussian_smoothing(x, kernel_size, sigma, padding=0):
    """Depthwise Gaussian blur == F.conv2d(x, gaussian_weight, groups=C, padding=padding)."""
    if isinstance(kernel_size, (int, float)):
        kernel_size = [int(kernel_size)] * 2
    if isinstance(sigma, (int, float)):
        sigma = [float(sigma)] * 2
    kv_size, kh_size = int(kernel_size[0]), int(kernel_size[1])
    pad = int(padding)
    w_v = _gaussian_taps_1d(kv_size, float(sigma[0]))   # taps along H
    w_h = _gaussian_taps_1d(kh_size, float(sigma[1]))   # taps along W

    n, c, h, w = x.shape
    h_pad, w_pad = h + 2 * pad, w + 2 * pad
    h_out = h_pad - kv_size + 1
    w_out = w_pad - kh_size + 1
    assert h_out > 0 and w_out > 0, "kernel larger than (padded) input"

    p = n * c
    x3 = x.reshape(p, h, w)   # pure reshape, no data movement

    # --- VMEM accounting (per plane, in bytes): double-buffered pipeline blocks,
    # the pad scratch, and the in-kernel f32 intermediates (partials/tmp/roll/acc).
    itemsize = x.dtype.itemsize
    per_plane = 2 * h * w * itemsize + 2 * h_out * w_out * itemsize
    if pad:
        per_plane += h_pad * w_pad * itemsize
    per_plane += 4 * h_out * w_pad * 4

    vmem_cap = _vmem_capacity_bytes()
    num_cores = _num_tensorcores()
    vmem_limit = min(vmem_cap * 3 // 4, 96 * 1024 * 1024)   # 96 MiB on 128-MiB chips, 48 on v7x
    budget = min(vmem_limit // 2, 48 * 1024 * 1024)

    cap = max(1, min(p, budget // max(per_plane, 1)))
    p_blk = _choose_p_blk(p, cap, num_cores)
    steps = -(-p // p_blk)
    # TODO(synk): if a single plane exceeds the VMEM budget (very large H*W), add row-strip
    # tiling with a (kv-1)-row halo on the H axis instead of one plane per step.
    # TODO(synk): for narrow W (not a multiple of 128), a planes-on-lanes layout
    # ((H, W, N*C) blocks) would make loads/stores lane-dense and remove the XLU rolls.

    scratch_shapes = []
    if pad:
        scratch_shapes.append(pltpu.VMEM((p_blk, h_pad, w_pad), x.dtype))

    kernel = _make_blur_kernel(
        w_v, w_h, pad, h, w, h_out, w_out, with_pad_scratch=bool(pad)
    )

    cost = pl.CostEstimate(
        flops=2 * (kv_size + kh_size) * p * h_out * w_out,
        transcendentals=0,
        bytes_accessed=p * (h * w + h_out * w_out) * itemsize,
    )

    out3 = pl.pallas_call(
        kernel,
        out_shape=jax.ShapeDtypeStruct((p, h_out, w_out), x.dtype),
        grid_spec=pltpu.PrefetchScalarGridSpec(
            num_scalar_prefetch=0,
            grid=(steps,),
            in_specs=[pl.BlockSpec((p_blk, h, w), lambda i: (i, 0, 0))],
            out_specs=pl.BlockSpec((p_blk, h_out, w_out), lambda i: (i, 0, 0)),
            scratch_shapes=tuple(scratch_shapes),
        ),
        compiler_params=pltpu.CompilerParams(
            dimension_semantics=("parallel",),
            vmem_limit_bytes=int(vmem_limit),
        ),
        cost_estimate=cost,
    )(x3)
    return out3.reshape(n, c, h_out, w_out)


class GaussianSmoothing:
    """Mirror of the PyTorch module: construct with (kernel_size, sigma, channels), call with (x, padding)."""

    def __init__(self, kernel_size, sigma, channels=1):
        self.kernel_size = kernel_size
        self.sigma = sigma
        self.channels = channels
        # Same (C,1,K,K) buffer the torch module registers (for parity / reference checks).
        # The module always tiles ONE shared separable kernel across channels, so the Pallas
        # path bakes shared 1-D taps.
        # TODO(synk): arbitrary per-channel depthwise weights would need per-channel indexing.
        self.weight = make_gaussian_weight(kernel_size, sigma, channels)

    def __call__(self, x, padding=0):
        assert x.shape[1] == self.channels
        return gaussian_smoothing(x, self.kernel_size, self.sigma, padding=padding)


def _reference(x, weight, padding=0):
    """Pure-JAX reference (shift-and-sum depthwise conv) for validation."""
    n, c, h, w = x.shape
    k = weight.shape[-1]
    if padding:
        x = jnp.pad(x, ((0, 0), (0, 0), (padding, padding), (padding, padding)))
        h, w = x.shape[2], x.shape[3]
    h_out, w_out = h - k + 1, w - k + 1
    acc = jnp.zeros((n, c, h_out, w_out), jnp.float32)
    for i in range(k):
        for j in range(k):
            acc = acc + weight[None, :, 0, i, j][..., None, None] * x[
                :, :, i:i + h_out, j:j + w_out
            ].astype(jnp.float32)
    return acc.astype(x.dtype)


if __name__ == "__main__":
    key = jax.random.PRNGKey(0)
    n, c, h, w = 2, 4, 16, 16
    kernel_size = 5
    sigma = 1.5

    x = jax.random.normal(key, (n, c, h, w), dtype=jnp.float32)
    smoother = GaussianSmoothing(kernel_size, sigma, channels=c)

    # "valid" (padding=0) path
    out = jax.block_until_ready(smoother(x, padding=0))
    ref = _reference(x, smoother.weight, padding=0)
    assert out.shape == (n, c, h - kernel_size + 1, w - kernel_size + 1)
    assert jnp.allclose(out, ref, atol=1e-5, rtol=1e-5), float(jnp.max(jnp.abs(out - ref)))

    # "same"-style (padding=2) path, as used by snow.py — padding now folded into the kernel.
    out_p = jax.block_until_ready(smoother(x, padding=2))
    ref_p = _reference(x, smoother.weight, padding=2)
    assert out_p.shape == (n, c, h, w)
    assert jnp.allclose(out_p, ref_p, atol=1e-5, rtol=1e-5), float(jnp.max(jnp.abs(out_p - ref_p)))

    print("KERNEL_OK")
</pallas_src>

<mosaic_0001>
module attributes {stable_mosaic.version = 11 : i64} {
  func.func @kernel(%arg0: i32, %arg1: memref<8x16x16xf32, #tpu.memory_space<vmem>>, %arg2: memref<8x12x12xf32, #tpu.memory_space<vmem>>) attributes {dimension_semantics = [#tpu.dimension_semantics<parallel>], iteration_bounds = array<i64: 1>, scalar_prefetch = 0 : i64, scratch_operands = 0 : i64, tpu.core_type = #tpu.core_type<tc>, window_params = [{transform_indices = @transform_0, window_bounds = array<i64: 8, 16, 16>}, {transform_indices = @transform_1, window_bounds = array<i64: 8, 12, 12>}]} {
    %c0 = arith.constant 0 : index
    %c0_0 = arith.constant 0 : index
    %c0_1 = arith.constant 0 : index
    %0 = vector.load %arg1[%c0, %c0_0, %c0_1] : memref<8x16x16xf32, #tpu.memory_space<vmem>>, vector<8x12x16xf32>
    %cst = arith.constant 0.120078385 : f32
    %1 = vector.broadcast %cst : f32 to vector<8x12x16xf32>
    %2 = arith.mulf %1, %0 : vector<8x12x16xf32>
    %c0_2 = arith.constant 0 : index
    %c1 = arith.constant 1 : index
    %c0_3 = arith.constant 0 : index
    %3 = vector.load %arg1[%c0_2, %c1, %c0_3] : memref<8x16x16xf32, #tpu.memory_space<vmem>>, vector<8x12x16xf32>
    %cst_4 = arith.constant 0.233880758 : f32
    %4 = vector.broadcast %cst_4 : f32 to vector<8x12x16xf32>
    %5 = arith.mulf %4, %3 : vector<8x12x16xf32>
    %c0_5 = arith.constant 0 : index
    %c2 = arith.constant 2 : index
    %c0_6 = arith.constant 0 : index
    %6 = vector.load %arg1[%c0_5, %c2, %c0_6] : memref<8x16x16xf32, #tpu.memory_space<vmem>>, vector<8x12x16xf32>
    %cst_7 = arith.constant 0.292081714 : f32
    %7 = vector.broadcast %cst_7 : f32 to vector<8x12x16xf32>
    %8 = arith.mulf %7, %6 : vector<8x12x16xf32>
    %9 = arith.addf %2, %8 : vector<8x12x16xf32>
    %c0_8 = arith.constant 0 : index
    %c3 = arith.constant 3 : index
    %c0_9 = arith.constant 0 : index
    %10 = vector.load %arg1[%c0_8, %c3, %c0_9] : memref<8x16x16xf32, #tpu.memory_space<vmem>>, vector<8x12x16xf32>
    %cst_10 = arith.constant 0.233880758 : f32
    %11 = vector.broadcast %cst_10 : f32 to vector<8x12x16xf32>
    %12 = arith.mulf %11, %10 : vector<8x12x16xf32>
    %13 = arith.addf %5, %12 : vector<8x12x16xf32>
    %c0_11 = arith.constant 0 : index
    %c4 = arith.constant 4 : index
    %c0_12 = arith.constant 0 : index
    %14 = vector.load %arg1[%c0_11, %c4, %c0_12] : memref<8x16x16xf32, #tpu.memory_space<vmem>>, vector<8x12x16xf32>
    %cst_13 = arith.constant 0.120078385 : f32
    %15 = vector.broadcast %cst_13 : f32 to vector<8x12x16xf32>
    %16 = arith.mulf %15, %14 : vector<8x12x16xf32>
    %17 = arith.addf %9, %16 : vector<8x12x16xf32>
    %18 = arith.addf %17, %13 : vector<8x12x16xf32>
    %cst_14 = arith.constant 0.120078385 : f32
    %19 = vector.broadcast %cst_14 : f32 to vector<8x12x16xf32>
    %20 = arith.mulf %19, %18 : vector<8x12x16xf32>
    %c15_i32 = arith.constant 15 : i32
    %21 = tpu.dynamic_rotate %18 by %c15_i32 dim 2 : vector<8x12x16xf32>, i32 -> vector<8x12x16xf32>
    %cst_15 = arith.constant 0.233880758 : f32
    %22 = vector.broadcast %cst_15 : f32 to vector<8x12x16xf32>
    %23 = arith.mulf %22, %21 : vector<8x12x16xf32>
    %c14_i32 = arith.constant 14 : i32
    %24 = tpu.dynamic_rotate %18 by %c14_i32 dim 2 : vector<8x12x16xf32>, i32 -> vector<8x12x16xf32>
    %cst_16 = arith.constant 0.292081714 : f32
    %25 = vector.broadcast %cst_16 : f32 to vector<8x12x16xf32>
    %26 = arith.mulf %25, %24 : vector<8x12x16xf32>
    %27 = arith.addf %20, %26 : vector<8x12x16xf32>
    %c13_i32 = arith.constant 13 : i32
    %28 = tpu.dynamic_rotate %18 by %c13_i32 dim 2 : vector<8x12x16xf32>, i32 -> vector<8x12x16xf32>
    %cst_17 = arith.constant 0.233880758 : f32
    %29 = vector.broadcast %cst_17 : f32 to vector<8x12x16xf32>
    %30 = arith.mulf %29, %28 : vector<8x12x16xf32>
    %31 = arith.addf %23, %30 : vector<8x12x16xf32>
    %c12_i32 = arith.constant 12 : i32
    %32 = tpu.dynamic_rotate %18 by %c12_i32 dim 2 : vector<8x12x16xf32>, i32 -> vector<8x12x16xf32>
    %cst_18 = arith.constant 0.120078385 : f32
    %33 = vector.broadcast %cst_18 : f32 to vector<8x12x16xf32>
    %34 = arith.mulf %33, %32 : vector<8x12x16xf32>
    %35 = arith.addf %27, %34 : vector<8x12x16xf32>
    %36 = arith.addf %35, %31 : vector<8x12x16xf32>
    %37 = vector.extract_strided_slice %36 {offsets = [0, 0, 0], sizes = [8, 12, 12], strides = [1, 1, 1]} : vector<8x12x16xf32> to vector<8x12x12xf32>
    %c0_19 = arith.constant 0 : index
    %c0_20 = arith.constant 0 : index
    %c0_21 = arith.constant 0 : index
    %38 = vector.load %arg2[%c0_19, %c0_20, %c0_21] : memref<8x12x12xf32, #tpu.memory_space<vmem>>, vector<8x12x12xf32>
    tpu.vector_store %arg2[%c0_19, %c0_20, %c0_21], %37 {strides = array<i32>} : memref<8x12x12xf32, #tpu.memory_space<vmem>>, vector<8x12x12xf32>,
    return
  }
  func.func @transform_0(%arg0: i32) -> (i32, i32, i32) {
    %c0_i32 = arith.constant 0 : i32
    %c0_i32_0 = arith.constant 0 : i32
    %c0_i32_1 = arith.constant 0 : i32
    return %arg0, %c0_i32, %c0_i32_0 : i32, i32, i32
  }
  func.func @transform_1(%arg0: i32) -> (i32, i32, i32) {
    %c0_i32 = arith.constant 0 : i32
    %c0_i32_0 = arith.constant 0 : i32
    %c0_i32_1 = arith.constant 0 : i32
    return %arg0, %c0_i32, %c0_i32_0 : i32, i32, i32
  }
}

</mosaic_0001>

<bundles_post_ra>
// kernel: tpu_custom_call.1
= control target key start
LH: loop header
LB: loop body
LE: loop exit
PB: predicated region body
PF: predicated region fallthrough
CT: control target
= control target key end

     0   :  { %6 = vsyncpa [#allocation3], 0  ;;  %s781_s6 = smov [#allocation2]   ;;  %s1287_s0 = inlined_call_operand.hbm [shape: f32[8,16,16], index: 0, kind: input, shape index: {}]   ;;  %s1288_s1 = inlined_call_operand.vmem [shape: f32[8,12,12], index: 1, kind: output, shape index: {}]  }
   0x1   :  { %s12_s7 = sshll.u32 %s781_s6, 4  ;;  %s757_s10 = scalar_lea.hbm %s1287_s0, 2048  ;;  %s13_s7 = int_to_ptr.vmem [resolvable:$true] %s12_s7 }
   0x2   :  { %p758_p0 = scmp.ne.s32.totalorder %s1287_s0, %s757_s10  ;;  %p761_p1 = scmp.lt.u32.totalorder %s757_s10, %s1287_s0 }
   0x4   :  { %p763_p2 = pnand %p761_p1, %p758_p0 }
   0x6   :  { %766 = shalt.err (!%p763_p2)
}
   0x7   :  { %s767_s15 = scalar_lea.vmem %s13_s7, 2048  ;;  %p772_p4 = scmp.lt.s32.totalorder %s13_s7, %s13_s7 }
   0x8   :  { %p768_p3 = scmp.ne.s32.totalorder %s13_s7, %s767_s15  ;;  %p773_p5 = scmp.lt.s32.totalorder %s767_s15, %s767_s15 }
   0xa   :  { %p774_p6 = por %p773_p5, %p772_p4 }
   0xc   :  { %p775_p7 = pnand %p774_p6, %p768_p3 }
   0xe   :  { %778 = shalt.err (!%p775_p7)
}
   0xf   :  { %s782_s16 = smov 128   ;;  %s783_s17 = smov 8  }
  0x10   :  { %18 = dma.hbm_to_vmem [thread:$0]  %s1287_s0, 2048, %s13_s7, [#allocation3], %s782_s16, %s782_s16, %s783_s17  }
  0x11   :  { %779 = dma.done.wait [#allocation3], 2048  }
  0x12   :  { %780 = vsyncadd [#allocation3], 4294965248  ;;  %v22_v0 = vld [vmem:[#allocation2] sm:$0xff]  ;;  %v24_v8 = vld [vmem:[#allocation2 + $0x10] sm:$0xff]  ;;  %s784_s0 = smov 16   ;;  %vm262_vm0 = vcmask 1047680  }
  0x13   :  { %v54_v1 = vld [vmem:[#allocation2 + $0x1] sm:$0xff]  ;;  %v38_v3 = vmul.f32 0.120078385, %v22_v0  ;;  %v40_v12 = vmul.f32 0.120078385, %v24_v8  ;;  %v56_v13 = vld [vmem:[#allocation2 + $0x11] sm:$0xff] }
  0x14   :  { %v86_v2 = vld [vmem:[#allocation2 + $0x2] sm:$0xff]  ;;  %v70_v4 = vmul.f32 0.23388076, %v54_v1  ;;  %v88_v14 = vld [vmem:[#allocation2 + $0x12] sm:$0xff]  ;;  %v72_v18 = vmul.f32 0.23388076, %v56_v13 }
  0x15   :  { %v102_v5 = vmul.f32 0.2920817, %v86_v2  ;;  %v134_v6 = vld [vmem:[#allocation2 + $0x3] sm:$0xff]  ;;  %v136_v15 = vld [vmem:[#allocation2 + $0x13] sm:$0xff]  ;;  %v104_v19 = vmul.f32 0.2920817, %v88_v14 }
  0x16   :  { %v182_v7 = vld [vmem:[#allocation2 + $0x4] sm:$0xff]  ;;  %v150_v10 = vmul.f32 0.23388076, %v134_v6  ;;  %v184_v20 = vld [vmem:[#allocation2 + $0x14] sm:$0xff]  ;;  %v152_v21 = vmul.f32 0.23388076, %v136_v15 }
  0x17   :  { %v118_v9 = vadd.f32 %v102_v5, %v38_v3  ;;  %v198_v11 = vmul.f32 0.120078385, %v182_v7  ;;  %v200_v22 = vmul.f32 0.120078385, %v184_v20  ;;  %v23_v23 = vld [vmem:[#allocation2 + $0x8] sm:$0xf]  ;;  %v120_v25 = vadd.f32 %v104_v19, %v40_v12 }
  0x18   :  { %v166_v16 = vadd.f32 %v150_v10, %v70_v4  ;;  %v39_v26 = vmul.f32 0.120078385, %v23_v23  ;;  %v55_v27 = vld [vmem:[#allocation2 + $0x9] sm:$0xf]  ;;  %v168_v29 = vadd.f32 %v152_v21, %v72_v18  ;;  %v26_v33 = vld [vmem:[#allocation2 + $0x20] sm:$0xff]  ;;  %v28_v13 = vld [vmem:[#allocation2 + $0x30] sm:$0xff] }
  0x19   :  { %v214_v17 = vadd.f32 %v198_v11, %v118_v9  ;;  %v87_v28 = vld [vmem:[#allocation2 + $0xa] sm:$0xf]  ;;  %v71_v30 = vmul.f32 0.23388076, %v55_v27  ;;  %v216_v34 = vadd.f32 %v200_v22, %v120_v25  ;;  %v25_v37 = vld [vmem:[#allocation2 + $0x18] sm:$0xf] }
  0x1a   :  { %v103_v31 = vmul.f32 0.2920817, %v87_v28  ;;  %v135_v32 = vld [vmem:[#allocation2 + $0xb] sm:$0xf]  ;;  %v41_v40 = vmul.f32 0.120078385, %v25_v37 }
  0x1b   :  { %v810_v24 = vadd.f32 %v214_v17, %v166_v16  ;;  %v151_v35 = vmul.f32 0.23388076, %v135_v32  ;;  %v183_v36 = vld [vmem:[#allocation2 + $0xc] sm:$0xf]  ;;  %v57_v41 = vld [vmem:[#allocation2 + $0x19] sm:$0xf]  ;;  %v814_v42 = vadd.f32 %v216_v34, %v168_v29 }
  0x1c   :  { %v119_v38 = vadd.f32 %v103_v31, %v39_v26  ;;  %v199_v39 = vmul.f32 0.120078385, %v183_v36  ;;  %v73_v44 = vmul.f32 0.23388076, %v57_v41  ;;  %v89_v45 = vld [vmem:[#allocation2 + $0x1a] sm:$0xf] }
  0x1d   :  { %263 = vrot.lane.b32.xlu0 %v810_v24, %s784_s0  ;;  %v167_v43 = vadd.f32 %v151_v35, %v71_v30  ;;  %v137_v46 = vld [vmem:[#allocation2 + $0x1b] sm:$0xf]  ;;  %v105_v48 = vmul.f32 0.2920817, %v89_v45  ;;  %269 = vrot.lane.b32.xlu1 %v814_v42, %s784_s0  ;;  %v42_v52 = vmul.f32 0.120078385, %v26_v33 }
  0x1e   :  { %v215_v47 = vadd.f32 %v199_v39, %v119_v38  ;;  %v153_v49 = vmul.f32 0.23388076, %v137_v46  ;;  %v185_v50 = vld [vmem:[#allocation2 + $0x1c] sm:$0xf]  ;;  %v58_v53 = vld [vmem:[#allocation2 + $0x21] sm:$0xff]  ;;  %v60_v14 = vld [vmem:[#allocation2 + $0x31] sm:$0xff] }
  0x1f   :  { %v201_v51 = vmul.f32 0.120078385, %v185_v50  ;;  %v90_v54 = vld [vmem:[#allocation2 + $0x22] sm:$0xff]  ;;  %v121_v56 = vadd.f32 %v105_v48, %v41_v40  ;;  %v74_v58 = vmul.f32 0.23388076, %v58_v53  ;;  %v92_v19 = vld [vmem:[#allocation2 + $0x32] sm:$0xff] }
  0x20   :  { %v818_v55 = vadd.f32 %v215_v47, %v167_v43  ;;  %v169_v57 = vadd.f32 %v153_v49, %v73_v44  ;;  %v138_v59 = vld [vmem:[#allocation2 + $0x23] sm:$0xff]  ;;  %v106_v62 = vmul.f32 0.2920817, %v90_v54  ;;  %v139_v9 = vld [vmem:[#allocation2 + $0x2b] sm:$0xf]  ;;  %v140_v20 = vld [vmem:[#allocation2 + $0x33] sm:$0xff] }
  0x21   :  { %v186_v60 = vld [vmem:[#allocation2 + $0x24] sm:$0xff]  ;;  %v154_v63 = vmul.f32 0.23388076, %v138_v59  ;;  %v217_v1 = vadd.f32 %v201_v51, %v121_v56  ;;  %v155_v11 = vmul.f32 0.23388076, %v139_v9  ;;  %v188_v28 = vld [vmem:[#allocation2 + $0x34] sm:$0xff] }
  0x22   :  { %v27_v61 = vld [vmem:[#allocation2 + $0x28] sm:$0xf]  ;;  %v202_v0 = vmul.f32 0.120078385, %v186_v60  ;;  %266 = vrot.lane.b32.xlu0 %v818_v55, %s784_s0  ;;  %v122_v5 = vadd.f32 %v106_v62, %v42_v52  ;;  %v187_v12 = vld [vmem:[#allocation2 + $0x2c] sm:$0xf] }
  0x23   :  { %v43_v2 = vmul.f32 0.120078385, %v27_v61  ;;  %v59_v3 = vld [vmem:[#allocation2 + $0x29] sm:$0xf]  ;;  %v170_v6 = vadd.f32 %v154_v63, %v74_v58  ;;  %v822_v10 = vadd.f32 %v217_v1, %v169_v57  ;;  %v203_v17 = vmul.f32 0.120078385, %v187_v12 }
  0x24   :  { %v91_v4 = vld [vmem:[#allocation2 + $0x2a] sm:$0xf]  ;;  %v75_v7 = vmul.f32 0.23388076, %v59_v3  ;;  %v218_v15 = vadd.f32 %v202_v0, %v122_v5  ;;  %v44_v18 = vmul.f32 0.120078385, %v28_v13 }
  0x25   :  { %v107_v8 = vmul.f32 0.2920817, %v91_v4  ;;  %272 = vrot.lane.b32.xlu1 %v822_v10, %s784_s0  ;;  %v76_v22 = vmul.f32 0.23388076, %v60_v14  ;;  %v108_v23 = vmul.f32 0.2920817, %v92_v19 }
  0x26   :  { %v171_v21 = vadd.f32 %v155_v11, %v75_v7  ;;  %v156_v25 = vmul.f32 0.23388076, %v140_v20  ;;  %v826_v26 = vadd.f32 %v218_v15, %v170_v6  ;;  %v29_v29 = vld [vmem:[#allocation2 + $0x38] sm:$0xf]  ;;  %v204_v33 = vmul.f32 0.120078385, %v188_v28 }
  0x27   :  { %v123_v16 = vadd.f32 %v107_v8, %v43_v2  ;;  %v61_v30 = vld [vmem:[#allocation2 + $0x39] sm:$0xf]  ;;  %v124_v31 = vadd.f32 %v108_v23, %v44_v18  ;;  %v45_v34 = vmul.f32 0.120078385, %v29_v29  ;;  %v30_v44 = vld [vmem:[#allocation2 + $0x40] sm:$0xff]  ;;  %v32_v11 = vld [vmem:[#allocation2 + $0x50] sm:$0xff] }
  0x28   :  { %v172_v32 = vadd.f32 %v156_v25, %v76_v22  ;;  %v93_v35 = vld [vmem:[#allocation2 + $0x3a] sm:$0xf]  ;;  %275 = vrot.lane.b32.xlu0 %v826_v26, %s784_s0  ;;  %v77_v37 = vmul.f32 0.23388076, %v61_v30  ;;  %v62_v45 = vld [vmem:[#allocation2 + $0x41] sm:$0xff]  ;;  %v64_v12 = vld [vmem:[#allocation2 + $0x51] sm:$0xff] }
  0x29   :  { %v219_v27 = vadd.f32 %v203_v17, %v123_v16  ;;  %v109_v38 = vmul.f32 0.2920817, %v93_v35  ;;  %v141_v39 = vld [vmem:[#allocation2 + $0x3b] sm:$0xf]  ;;  %v220_v40 = vadd.f32 %v204_v33, %v124_v31  ;;  %v46_v48 = vmul.f32 0.120078385, %v30_v44 }
  0x2a   :  { %v157_v41 = vmul.f32 0.23388076, %v141_v39  ;;  %v189_v43 = vld [vmem:[#allocation2 + $0x3c] sm:$0xf]  ;;  %v78_v49 = vmul.f32 0.23388076, %v62_v45 }
  0x2b   :  { %v830_v36 = vadd.f32 %v219_v27, %v171_v21  ;;  %v125_v46 = vadd.f32 %v109_v38, %v45_v34  ;;  %v205_v47 = vmul.f32 0.120078385, %v189_v43  ;;  %v834_v50 = vadd.f32 %v220_v40, %v172_v32  ;;  %v94_v52 = vld [vmem:[#allocation2 + $0x42] sm:$0xff]  ;;  %v95_v62 = vld [vmem:[#allocation2 + $0x4a] sm:$0xf]  ;;  %v96_v13 = vld [vmem:[#allocation2 + $0x52] sm:$0xff] }
  0x2c   :  { %v173_v51 = vadd.f32 %v157_v41, %v77_v37  ;;  %v142_v53 = vld [vmem:[#allocation2 + $0x43] sm:$0xff]  ;;  %v110_v57 = vmul.f32 0.2920817, %v94_v52  ;;  %v143_v3 = vld [vmem:[#allocation2 + $0x4b] sm:$0xf]  ;;  %v144_v18 = vld [vmem:[#allocation2 + $0x53] sm:$0xff] }
  0x2d   :  { %278 = vrot.lane.b32.xlu1 %v830_v36, %s784_s0  ;;  %v190_v54 = vld [vmem:[#allocation2 + $0x44] sm:$0xff]  ;;  %v221_v56 = vadd.f32 %v205_v47, %v125_v46  ;;  %v158_v58 = vmul.f32 0.23388076, %v142_v53  ;;  %281 = vrot.lane.b32.xlu0 %v834_v50, %s784_s0  ;;  %v191_v4 = vld [vmem:[#allocation2 + $0x4c] sm:$0xf]  ;;  %v192_v19 = vld [vmem:[#allocation2 + $0x54] sm:$0xff] }
  0x2e   :  { %v206_v59 = vmul.f32 0.120078385, %v190_v54  ;;  %v31_v60 = vld [vmem:[#allocation2 + $0x48] sm:$0xf]  ;;  %v126_v0 = vadd.f32 %v110_v57, %v46_v48  ;;  %v111_v6 = vmul.f32 0.2920817, %v95_v62 }
  0x2f   :  { %v63_v61 = vld [vmem:[#allocation2 + $0x49] sm:$0xf]  ;;  %v838_v63 = vadd.f32 %v221_v56, %v173_v51  ;;  %v174_v1 = vadd.f32 %v158_v58, %v78_v49  ;;  %v47_v2 = vmul.f32 0.120078385, %v31_v60  ;;  %v159_v7 = vmul.f32 0.23388076, %v143_v3 }
  0x30   :  { %v79_v5 = vmul.f32 0.23388076, %v63_v61  ;;  %v222_v8 = vadd.f32 %v206_v59, %v126_v0  ;;  %v207_v9 = vmul.f32 0.120078385, %v191_v4  ;;  %v48_v16 = vmul.f32 0.120078385, %v32_v11 }
  0x31   :  { %284 = vrot.lane.b32.xlu1 %v838_v63, %s784_s0  ;;  %v127_v14 = vadd.f32 %v111_v6, %v47_v2  ;;  %v80_v17 = vmul.f32 0.23388076, %v64_v12  ;;  %v112_v21 = vmul.f32 0.2920817, %v96_v13  ;;  %v160_v22 = vmul.f32 0.23388076, %v144_v18 }
  0x32   :  { %v175_v15 = vadd.f32 %v159_v7, %v79_v5  ;;  %v842_v20 = vadd.f32 %v222_v8, %v174_v1  ;;  %v208_v23 = vmul.f32 0.120078385, %v192_v19  ;;  %v33_v27 = vld [vmem:[#allocation2 + $0x58] sm:$0xf]  ;;  %v193_v39 = vld [vmem:[#allocation2 + $0x5c] sm:$0xf] }
  0x33   :  { %v223_v25 = vadd.f32 %v207_v9, %v127_v14  ;;  %v65_v28 = vld [vmem:[#allocation2 + $0x59] sm:$0xf]  ;;  %v128_v30 = vadd.f32 %v112_v21, %v48_v16  ;;  %v176_v31 = vadd.f32 %v160_v22, %v80_v17  ;;  %v49_v32 = vmul.f32 0.120078385, %v33_v27  ;;  %v34_v43 = vld [vmem:[#allocation2 + $0x60] sm:$0xff]  ;;  %v36_v11 = vld [vmem:[#allocation2 + $0x70] sm:$0xff] }
  0x34   :  { %v97_v29 = vld [vmem:[#allocation2 + $0x5a] sm:$0xf]  ;;  %287 = vrot.lane.b32.xlu0 %v842_v20, %s784_s0  ;;  %v81_v33 = vmul.f32 0.23388076, %v65_v28  ;;  %v209_v41 = vmul.f32 0.120078385, %v193_v39 }
  0x35   :  { %v145_v34 = vld [vmem:[#allocation2 + $0x5b] sm:$0xf]  ;;  %v846_v35 = vadd.f32 %v223_v25, %v175_v15  ;;  %v113_v37 = vmul.f32 0.2920817, %v97_v29  ;;  %v224_v40 = vadd.f32 %v208_v23, %v128_v30  ;;  %v66_v44 = vld [vmem:[#allocation2 + $0x61] sm:$0xff]  ;;  %v68_v12 = vld [vmem:[#allocation2 + $0x71] sm:$0xff] }
  0x36   :  { %v161_v38 = vmul.f32 0.23388076, %v145_v34  ;;  %v98_v45 = vld [vmem:[#allocation2 + $0x62] sm:$0xff]  ;;  %v50_v48 = vmul.f32 0.120078385, %v34_v43  ;;  %v100_v13 = vld [vmem:[#allocation2 + $0x72] sm:$0xff] }
  0x37   :  { %290 = vrot.lane.b32.xlu1 %v846_v35, %s784_s0  ;;  %v129_v46 = vadd.f32 %v113_v37, %v49_v32  ;;  %v82_v49 = vmul.f32 0.23388076, %v66_v44  ;;  %v146_v51 = vld [vmem:[#allocation2 + $0x63] sm:$0xff]  ;;  %v850_v53 = vadd.f32 %v224_v40, %v176_v31  ;;  %v114_v54 = vmul.f32 0.2920817, %v98_v45  ;;  %v148_v18 = vld [vmem:[#allocation2 + $0x73] sm:$0xff] }
  0x38   :  { %v177_v47 = vadd.f32 %v161_v38, %v81_v33  ;;  %v194_v52 = vld [vmem:[#allocation2 + $0x64] sm:$0xff]  ;;  %v162_v56 = vmul.f32 0.23388076, %v146_v51  ;;  %v195_v7 = vld [vmem:[#allocation2 + $0x6c] sm:$0xf]  ;;  %v196_v19 = vld [vmem:[#allocation2 + $0x74] sm:$0xff] }
  0x39   :  { %v210_v57 = vmul.f32 0.120078385, %v194_v52  ;;  %v225_v58 = vadd.f32 %v209_v41, %v129_v46  ;;  %v35_v59 = vld [vmem:[#allocation2 + $0x68] sm:$0xf]  ;;  %293 = vrot.lane.b32.xlu0 %v850_v53, %s784_s0  ;;  %v130_v62 = vadd.f32 %v114_v54, %v50_v48  ;;  %v211_v9 = vmul.f32 0.120078385, %v195_v7 }
  0x3a   :  { %v67_v60 = vld [vmem:[#allocation2 + $0x69] sm:$0xf]  ;;  %v178_v0 = vadd.f32 %v162_v56, %v82_v49  ;;  %v51_v1 = vmul.f32 0.120078385, %v35_v59  ;;  %v52_v16 = vmul.f32 0.120078385, %v36_v11 }
  0x3b   :  { %v99_v61 = vld [vmem:[#allocation2 + $0x6a] sm:$0xf]  ;;  %v83_v2 = vmul.f32 0.23388076, %v67_v60  ;;  %v854_v4 = vadd.f32 %v225_v58, %v177_v47  ;;  %v226_v8 = vadd.f32 %v210_v57, %v130_v62  ;;  %v84_v17 = vmul.f32 0.23388076, %v68_v12 }
  0x3c   :  { %v147_v3 = vld [vmem:[#allocation2 + $0x6b] sm:$0xf]  ;;  %v115_v5 = vmul.f32 0.2920817, %v99_v61  ;;  %v116_v22 = vmul.f32 0.2920817, %v100_v13 }
  0x3d   :  { %v163_v6 = vmul.f32 0.23388076, %v147_v3  ;;  %296 = vrot.lane.b32.xlu1 %v854_v4, %s784_s0  ;;  %v858_v21 = vadd.f32 %v226_v8, %v178_v0  ;;  %v164_v23 = vmul.f32 0.23388076, %v148_v18  ;;  %v212_v25 = vmul.f32 0.120078385, %v196_v19 }
  0x3e   :  { %v131_v14 = vadd.f32 %v115_v5, %v51_v1  ;;  %v37_v28 = vld [vmem:[#allocation2 + $0x78] sm:$0xf]  ;;  %v132_v31 = vadd.f32 %v116_v22, %v52_v16  ;;  %v197_v41 = vld [vmem:[#allocation2 + $0x7c] sm:$0xf]  ;;  %s785_s20 = smov 126   ;;  %s786_s21 = smov 124  }
  0x3f   :  { %v179_v15 = vadd.f32 %v163_v6, %v83_v2  ;;  %v69_v29 = vld [vmem:[#allocation2 + $0x79] sm:$0xf]  ;;  %299 = vrot.lane.b32.xlu0 %v858_v21, %s784_s0  ;;  %v180_v32 = vadd.f32 %v164_v23, %v84_v17  ;;  %v53_v33 = vmul.f32 0.120078385, %v37_v28  ;;  %v213_v44 = vmul.f32 0.120078385, %v197_v41 }
  0x40   :  { %v227_v27 = vadd.f32 %v211_v9, %v131_v14  ;;  %v101_v30 = vld [vmem:[#allocation2 + $0x7a] sm:$0xf]  ;;  %v85_v34 = vmul.f32 0.23388076, %v69_v29  ;;  %v228_v43 = vadd.f32 %v212_v25, %v132_v31  ;;  %s787_s22 = smov 127   ;;  %vm727_vm1 = vcmask 97280  }
  0x41   :  { %v149_v37 = vld [vmem:[#allocation2 + $0x7b] sm:$0xf]  ;;  %v117_v39 = vmul.f32 0.2920817, %v101_v30  ;;  %vm729_vm2 = vcmask 93184  }
  0x42   :  { %v862_v38 = vadd.f32 %v227_v27, %v179_v15  ;;  %v165_v40 = vmul.f32 0.23388076, %v149_v37  ;;  %v866_v47 = vadd.f32 %v228_v43, %v180_v32 }
  0x43   :  { %v133_v45 = vadd.f32 %v117_v39, %v53_v33 }
  0x44   :  { %302 = vrot.lane.b32.xlu1 %v862_v38, %s784_s0  ;;  %v181_v46 = vadd.f32 %v165_v40, %v85_v34  ;;  %305 = vrot.lane.b32.xlu0 %v866_v47, %s784_s0 }
  0x45   :  { %v229_v48 = vadd.f32 %v213_v44, %v133_v45 }
  0x47   :  { %v870_v49 = vadd.f32 %v229_v48, %v181_v46 }
  0x49   :  { %308 = vrot.lane.b32.xlu1 %v870_v49, %s784_s0 }
  0x8f   :  { %v264_v51 = vpop.permute.xlu0 %263  ;;  %v270_v54 = vpop.permute.xlu1 %269 }
  0x90   :  { %v265_v52 = vsel %vm262_vm0, %v264_v51, %v810_v24  ;;  %v271_v56 = vsel %vm262_vm0, %v270_v54, %v814_v42 }
  0x91   :  { %311 = vrot.lane.b32.xlu0 %v265_v52, %s784_s0 }
  0x94   :  { %v267_v57 = vpop.permute.xlu0 %266 }
  0x95   :  { %315 = vrot.lane.b32.xlu0 %v271_v56, %s784_s0  ;;  %v268_v58 = vsel %vm262_vm0, %v267_v57, %v818_v55 }
  0x96   :  { %313 = vrot.lane.b32.xlu1 %v268_v58, %s784_s0 }
  0x97   :  { %v273_v59 = vpop.permute.xlu1 %272 }
  0x98   :  { %v274_v60 = vsel %vm262_vm0, %v273_v59, %v822_v10 }
  0x9a   :  { %317 = vrot.lane.b32.xlu1 %v274_v60, %s784_s0  ;;  %v276_v61 = vpop.permute.xlu0 %275 }
  0x9b   :  { %v277_v62 = vsel %vm262_vm0, %v276_v61, %v826_v26 }
  0x9c   :  { %319 = vrot.lane.b32.xlu0 %v277_v62, %s784_s0 }
  0x9f   :  { %v279_v0 = vpop.permute.xlu1 %278  ;;  %v282_v2 = vpop.permute.xlu0 %281 }
  0xa0   :  { %v280_v1 = vsel %vm262_vm0, %v279_v0, %v830_v36  ;;  %v283_v3 = vsel %vm262_vm0, %v282_v2, %v834_v50 }
  0xa1   :  { %321 = vrot.lane.b32.xlu1 %v280_v1, %s784_s0  ;;  %323 = vrot.lane.b32.xlu0 %v283_v3, %s784_s0 }
  0xa3   :  { %v285_v5 = vpop.permute.xlu1 %284 }
  0xa4   :  { %v286_v6 = vsel %vm262_vm0, %v285_v5, %v838_v63 }
  0xa5   :  { %325 = vrot.lane.b32.xlu1 %v286_v6, %s784_s0 }
  0xa6   :  { %v288_v7 = vpop.permute.xlu0 %287 }
  0xa7   :  { %v289_v8 = vsel %vm262_vm0, %v288_v7, %v842_v20 }
  0xa8   :  { %327 = vrot.lane.b32.xlu0 %v289_v8, %s784_s0 }
  0xa9   :  { %v291_v9 = vpop.permute.xlu1 %290 }
  0xaa   :  { %v292_v11 = vsel %vm262_vm0, %v291_v9, %v846_v35 }
  0xab   :  { %329 = vrot.lane.b32.xlu1 %v292_v11, %s784_s0  ;;  %v294_v12 = vpop.permute.xlu0 %293 }
  0xac   :  { %v295_v13 = vsel %vm262_vm0, %v294_v12, %v850_v53 }
  0xad   :  { %331 = vrot.lane.b32.xlu0 %v295_v13, %s784_s0 }
  0xaf   :  { %v297_v14 = vpop.permute.xlu1 %296 }
  0xb0   :  { %v298_v15 = vsel %vm262_vm0, %v297_v14, %v854_v4 }
  0xb1   :  { %333 = vrot.lane.b32.xlu1 %v298_v15, %s784_s0  ;;  %v300_v16 = vpop.permute.xlu0 %299 }
  0xb2   :  { %v301_v17 = vsel %vm262_vm0, %v300_v16, %v858_v21 }
  0xb3   :  { %335 = vrot.lane.b32.xlu0 %v301_v17, %s784_s0 }
  0xb6   :  { %v303_v18 = vpop.permute.xlu1 %302  ;;  %v306_v22 = vpop.permute.xlu0 %305 }
  0xb7   :  { %v304_v19 = vsel %vm262_vm0, %v303_v18, %v862_v38  ;;  %v307_v23 = vsel %vm262_vm0, %v306_v22, %v866_v47 }
  0xb8   :  { %337 = vrot.lane.b32.xlu1 %v304_v19, %s784_s0  ;;  %339 = vrot.lane.b32.xlu0 %v307_v23, %s784_s0 }
  0xbb   :  { %v309_v25 = vpop.permute.xlu1 %308 }
  0xbc   :  { %v310_v27 = vsel %vm262_vm0, %v309_v25, %v870_v49 }
  0xbd   :  { %341 = vrot.lane.b32.xlu1 %v310_v27, %s784_s0 }
 0x103   :  { %v312_v28 = vpop.permute.xlu0 %311 }
 0x104   :  { %v924_v29 = vsel %vm262_vm0, %v312_v28, %v810_v24 }
 0x105   :  { %v375_v30 = vmul.f32 0.2920817, %v924_v29  ;;  %v940_v40 = vmul.f32 0.23388076, %v924_v29 }
 0x107   :  { %407 = vrot.lane.b32.xlu0 %v375_v30, %s785_s20  ;;  %v316_v31 = vpop.permute.xlu0 %315 }
 0x108   :  { %v930_v32 = vsel %vm262_vm0, %v316_v31, %v814_v42  ;;  %v314_v34 = vpop.permute.xlu1 %313 }
 0x109   :  { %v377_v33 = vmul.f32 0.2920817, %v930_v32  ;;  %v935_v37 = vsel %vm262_vm0, %v314_v34, %v818_v55  ;;  %v951_v45 = vmul.f32 0.23388076, %v930_v32 }
 0x10a   :  { %v376_v39 = vmul.f32 0.2920817, %v935_v37  ;;  %v964_v54 = vmul.f32 0.23388076, %v935_v37 }
 0x10b   :  { %411 = vrot.lane.b32.xlu0 %v377_v33, %s785_s20 }
 0x10c   :  { %409 = vrot.lane.b32.xlu1 %v376_v39, %s785_s20  ;;  %v318_v41 = vpop.permute.xlu1 %317 }
 0x10d   :  { %v945_v43 = vsel %vm262_vm0, %v318_v41, %v822_v10 }
 0x10e   :  { %v378_v44 = vmul.f32 0.2920817, %v945_v43  ;;  %v320_v46 = vpop.permute.xlu0 %319  ;;  %v979_v59 = vmul.f32 0.23388076, %v945_v43 }
 0x10f   :  { %487 = vrot.lane.b32.xlu0 %v940_v40, %s785_s20  ;;  %v956_v48 = vsel %vm262_vm0, %v320_v46, %v826_v26 }
 0x110   :  { %413 = vrot.lane.b32.xlu1 %v378_v44, %s785_s20  ;;  %v961_v52 = vmul.f32 0.23388076, %v956_v48  ;;  %v379_v34 = vmul.f32 0.2920817, %v956_v48 }
 0x113   :  { %491 = vrot.lane.b32.xlu0 %v951_v45, %s785_s20  ;;  %v322_v51 = vpop.permute.xlu1 %321  ;;  %v324_v56 = vpop.permute.xlu0 %323 }
 0x114   :  { %489 = vrot.lane.b32.xlu1 %v964_v54, %s785_s20  ;;  %v970_v57 = vsel %vm262_vm0, %v322_v51, %v830_v36  ;;  %v976_v58 = vsel %vm262_vm0, %v324_v56, %v834_v50 }
 0x115   :  { %v982_v60 = vmul.f32 0.23388076, %v976_v58  ;;  %v987_v62 = vmul.f32 0.23388076, %v970_v57  ;;  %v380_v39 = vmul.f32 0.2920817, %v970_v57 }
 0x116   :  { %v381_v41 = vmul.f32 0.2920817, %v976_v58 }
 0x117   :  { %495 = vrot.lane.b32.xlu0 %v961_v52, %s785_s20  ;;  %v326_v61 = vpop.permute.xlu1 %325 }
 0x118   :  { %493 = vrot.lane.b32.xlu1 %v979_v59, %s785_s20  ;;  %v991_v0 = vsel %vm262_vm0, %v326_v61, %v838_v63 }
 0x119   :  { %v1002_v3 = vmul.f32 0.23388076, %v991_v0  ;;  %v382_v44 = vmul.f32 0.2920817, %v991_v0 }
 0x11a   :  { %v328_v1 = vpop.permute.xlu0 %327 }
 0x11b   :  { %499 = vrot.lane.b32.xlu0 %v982_v60, %s785_s20  ;;  %v999_v2 = vsel %vm262_vm0, %v328_v1, %v842_v20 }
 0x11c   :  { %497 = vrot.lane.b32.xlu1 %v987_v62, %s785_s20  ;;  %v1005_v5 = vmul.f32 0.23388076, %v999_v2  ;;  %v383_v46 = vmul.f32 0.2920817, %v999_v2 }
 0x11d   :  { %v330_v6 = vpop.permute.xlu1 %329 }
 0x11e   :  { %v1009_v7 = vsel %vm262_vm0, %v330_v6, %v846_v35 }
 0x11f   :  { %503 = vrot.lane.b32.xlu0 %v1005_v5, %s785_s20  ;;  %v1016_v8 = vmul.f32 0.23388076, %v1009_v7  ;;  %v332_v9 = vpop.permute.xlu0 %331  ;;  %v384_v51 = vmul.f32 0.2920817, %v1009_v7 }
 0x120   :  { %501 = vrot.lane.b32.xlu1 %v1002_v3, %s785_s20  ;;  %v1020_v11 = vsel %vm262_vm0, %v332_v9, %v850_v53 }
 0x121   :  { %v1023_v12 = vmul.f32 0.23388076, %v1020_v11  ;;  %v385_v56 = vmul.f32 0.2920817, %v1020_v11 }
 0x123   :  { %v334_v13 = vpop.permute.xlu1 %333  ;;  %507 = vrot.lane.b32.xlu0 %v1023_v12, %s785_s20 }
 0x124   :  { %505 = vrot.lane.b32.xlu1 %v1016_v8, %s785_s20  ;;  %v1029_v14 = vsel %vm262_vm0, %v334_v13, %v854_v4 }
 0x125   :  { %v1034_v15 = vmul.f32 0.23388076, %v1029_v14  ;;  %v336_v16 = vpop.permute.xlu0 %335  ;;  %v386_v61 = vmul.f32 0.2920817, %v1029_v14 }
 0x126   :  { %v1038_v17 = vsel %vm262_vm0, %v336_v16, %v858_v21  ;;  %v551_v16 = vmul.f32 0.120078385, %v924_v29  ;;  %v556_v29 = vmul.f32 0.120078385, %v970_v57  ;;  %v562_v57 = vmul.f32 0.120078385, %v1029_v14 }
 0x127   :  { %v1043_v18 = vmul.f32 0.23388076, %v1038_v17  ;;  %v387_v1 = vmul.f32 0.2920817, %v1038_v17 }
 0x128   :  { %509 = vrot.lane.b32.xlu1 %v1034_v15, %s785_s20 }
 0x129   :  { %511 = vrot.lane.b32.xlu0 %v1043_v18, %s785_s20 }
 0x12a   :  { %v338_v19 = vpop.permute.xlu1 %337  ;;  %v340_v25 = vpop.permute.xlu0 %339 }
 0x12b   :  { %v356_v22 = vsel %vm262_vm0, %v338_v19, %v862_v38  ;;  %v357_v27 = vsel %vm262_vm0, %v340_v25, %v866_v47  ;;  %v552_v19 = vmul.f32 0.120078385, %v935_v37  ;;  %v553_v25 = vmul.f32 0.120078385, %v930_v32 }
 0x12c   :  { %v1049_v23 = vmul.f32 0.23388076, %v356_v22  ;;  %v1055_v28 = vmul.f32 0.23388076, %v357_v27  ;;  %v388_v6 = vmul.f32 0.2920817, %v356_v22 }
 0x12d   :  { %v389_v9 = vmul.f32 0.2920817, %v357_v27  ;;  %v558_v32 = vmul.f32 0.120078385, %v991_v0  ;;  %v559_v37 = vmul.f32 0.120078385, %v999_v2 }
 0x12e   :  { %513 = vrot.lane.b32.xlu1 %v1049_v23, %s785_s20  ;;  %515 = vrot.lane.b32.xlu0 %v1055_v28, %s785_s20  ;;  %v564_v0 = vmul.f32 0.120078385, %v356_v22  ;;  %v565_v2 = vmul.f32 0.120078385, %v357_v27 }
 0x12f   :  { %v342_v30 = vpop.permute.xlu1 %341 }
 0x130   :  { %v358_v31 = vsel %vm262_vm0, %v342_v30, %v870_v49  ;;  %v554_v30 = vmul.f32 0.120078385, %v945_v43  ;;  %v560_v43 = vmul.f32 0.120078385, %v1009_v7 }
 0x131   :  { %v1061_v33 = vmul.f32 0.23388076, %v358_v31  ;;  %v390_v13 = vmul.f32 0.2920817, %v358_v31  ;;  %v566_v7 = vmul.f32 0.120078385, %v358_v31 }
 0x132   :  { %415 = vrot.lane.b32.xlu0 %v379_v34, %s785_s20  ;;  %v555_v34 = vmul.f32 0.120078385, %v956_v48  ;;  %v561_v48 = vmul.f32 0.120078385, %v1020_v11 }
 0x133   :  { %517 = vrot.lane.b32.xlu1 %v1061_v33, %s785_s20 }
 0x136   :  { %419 = vrot.lane.b32.xlu0 %v381_v41, %s785_s20 }
 0x137   :  { %417 = vrot.lane.b32.xlu1 %v380_v39, %s785_s20  ;;  %v557_v39 = vmul.f32 0.120078385, %v976_v58  ;;  %v563_v58 = vmul.f32 0.120078385, %v1038_v17 }
 0x13a   :  { %423 = vrot.lane.b32.xlu0 %v383_v46, %s785_s20 }
 0x13b   :  { %421 = vrot.lane.b32.xlu1 %v382_v44, %s785_s20 }
 0x13e   :  { %427 = vrot.lane.b32.xlu0 %v385_v56, %s785_s20 }
 0x13f   :  { %425 = vrot.lane.b32.xlu1 %v384_v51, %s785_s20 }
 0x142   :  { %431 = vrot.lane.b32.xlu0 %v387_v1, %s785_s20 }
 0x143   :  { %429 = vrot.lane.b32.xlu1 %v386_v61, %s785_s20 }
 0x146   :  { %435 = vrot.lane.b32.xlu0 %v389_v9, %s785_s20 }
 0x147   :  { %433 = vrot.lane.b32.xlu1 %v388_v6, %s785_s20 }
 0x14a   :  { %583 = vrot.lane.b32.xlu0 %v551_v16, %s786_s21 }
 0x14b   :  { %437 = vrot.lane.b32.xlu1 %v390_v13, %s785_s20 }
 0x14e   :  { %587 = vrot.lane.b32.xlu0 %v553_v25, %s786_s21 }
 0x14f   :  { %585 = vrot.lane.b32.xlu1 %v552_v19, %s786_s21 }
 0x152   :  { %591 = vrot.lane.b32.xlu0 %v555_v34, %s786_s21 }
 0x153   :  { %589 = vrot.lane.b32.xlu1 %v554_v30, %s786_s21 }
 0x156   :  { %595 = vrot.lane.b32.xlu0 %v557_v39, %s786_s21 }
 0x157   :  { %593 = vrot.lane.b32.xlu1 %v556_v29, %s786_s21 }
 0x15a   :  { %599 = vrot.lane.b32.xlu0 %v559_v37, %s786_s21 }
 0x15b   :  { %597 = vrot.lane.b32.xlu1 %v558_v32, %s786_s21 }
 0x15e   :  { %603 = vrot.lane.b32.xlu0 %v561_v48, %s786_s21 }
 0x15f   :  { %601 = vrot.lane.b32.xlu1 %v560_v43, %s786_s21 }
 0x162   :  { %607 = vrot.lane.b32.xlu0 %v563_v58, %s786_s21 }
 0x163   :  { %605 = vrot.lane.b32.xlu1 %v562_v57, %s786_s21 }
 0x166   :  { %611 = vrot.lane.b32.xlu0 %v565_v2, %s786_s21 }
 0x167   :  { %609 = vrot.lane.b32.xlu1 %v564_v0, %s786_s21 }
 0x16b   :  { %613 = vrot.lane.b32.xlu1 %v566_v7, %s786_s21 }
 0x179   :  { %v1115_v11 = vpop.permute.xlu0 %407 }
 0x17d   :  { %v1117_v41 = vpop.permute.xlu0 %411 }
 0x17e   :  { %v1119_v14 = vpop.permute.xlu1 %409 }
 0x181   :  { %v488_v17 = vpop.permute.xlu0 %487 }
 0x182   :  { %v535_v44 = vadd.f32 %v488_v17, %v940_v40  ;;  %v1122_v46 = vpop.permute.xlu1 %413 }
 0x184   :  { %663 = vrot.lane.b32.xlu0 %v535_v44, %s787_s22 }
 0x185   :  { %v492_v22 = vpop.permute.xlu0 %491 }
 0x186   :  { %v537_v27 = vadd.f32 %v492_v22, %v951_v45  ;;  %v490_v31 = vpop.permute.xlu1 %489 }
 0x187   :  { %v536_v51 = vadd.f32 %v490_v31, %v964_v54 }
 0x188   :  { %667 = vrot.lane.b32.xlu0 %v537_v27, %s787_s22 }
 0x189   :  { %v496_v56 = vpop.permute.xlu0 %495  ;;  %665 = vrot.lane.b32.xlu1 %v536_v51, %s787_s22 }
 0x18a   :  { %v539_v61 = vadd.f32 %v496_v56, %v961_v52  ;;  %v494_v1 = vpop.permute.xlu1 %493 }
 0x18b   :  { %v538_v40 = vadd.f32 %v494_v1, %v979_v59 }
 0x18c   :  { %671 = vrot.lane.b32.xlu0 %v539_v61, %s787_s22 }
 0x18d   :  { %v500_v6 = vpop.permute.xlu0 %499  ;;  %669 = vrot.lane.b32.xlu1 %v538_v40, %s787_s22 }
 0x18e   :  { %v541_v9 = vadd.f32 %v500_v6, %v982_v60  ;;  %v498_v45 = vpop.permute.xlu1 %497 }
 0x18f   :  { %v540_v54 = vadd.f32 %v498_v45, %v987_v62 }
 0x190   :  { %675 = vrot.lane.b32.xlu0 %v541_v9, %s787_s22 }
 0x191   :  { %673 = vrot.lane.b32.xlu1 %v540_v54, %s787_s22  ;;  %v504_v52 = vpop.permute.xlu0 %503  ;;  %v246_v54 = vmul.f32 0.120078385, %v810_v24 }
 0x192   :  { %v502_v13 = vpop.permute.xlu1 %501  ;;  %v543_v16 = vadd.f32 %v504_v52, %v1005_v5 }
 0x193   :  { %v542_v19 = vadd.f32 %v502_v13, %v1002_v3  ;;  %v455_v13 = vadd.f32 %v1115_v11, %v246_v54  ;;  %v249_v11 = vmul.f32 0.120078385, %v822_v10 }
 0x194   :  { %679 = vrot.lane.b32.xlu0 %v543_v16, %s787_s22  ;;  %v248_v16 = vmul.f32 0.120078385, %v814_v42 }
 0x195   :  { %677 = vrot.lane.b32.xlu1 %v542_v19, %s787_s22  ;;  %v508_v25 = vpop.permute.xlu0 %507 }
 0x196   :  { %v506_v59 = vpop.permute.xlu1 %505  ;;  %v545_v30 = vadd.f32 %v508_v25, %v1023_v12 }
 0x197   :  { %v544_v60 = vadd.f32 %v506_v59, %v1016_v8 }
 0x198   :  { %683 = vrot.lane.b32.xlu0 %v545_v30, %s787_s22  ;;  %v457_v30 = vadd.f32 %v1117_v41, %v248_v16 }
 0x199   :  { %681 = vrot.lane.b32.xlu1 %v544_v60, %s787_s22  ;;  %v247_v60 = vmul.f32 0.120078385, %v818_v55 }
 0x19a   :  { %v510_v62 = vpop.permute.xlu1 %509 }
 0x19b   :  { %v546_v34 = vadd.f32 %v510_v62, %v1034_v15  ;;  %v512_v5 = vpop.permute.xlu0 %511  ;;  %v250_v62 = vmul.f32 0.120078385, %v826_v26  ;;  %v456_v42 = vadd.f32 %v1119_v14, %v247_v60  ;;  %v251_v14 = vmul.f32 0.120078385, %v830_v36 }
 0x19c   :  { %v547_v3 = vadd.f32 %v512_v5, %v1043_v18 }
 0x19d   :  { %685 = vrot.lane.b32.xlu1 %v546_v34, %s787_s22 }
 0x19e   :  { %687 = vrot.lane.b32.xlu0 %v547_v3, %s787_s22 }
 0x1a0   :  { %v514_v29 = vpop.permute.xlu1 %513  ;;  %v516_v39 = vpop.permute.xlu0 %515 }
 0x1a1   :  { %v548_v8 = vadd.f32 %v514_v29, %v1049_v23  ;;  %v549_v12 = vadd.f32 %v516_v39, %v1055_v28  ;;  %v252_v29 = vmul.f32 0.120078385, %v834_v50  ;;  %v254_v50 = vmul.f32 0.120078385, %v842_v20 }
 0x1a3   :  { %689 = vrot.lane.b32.xlu1 %v548_v8, %s787_s22  ;;  %691 = vrot.lane.b32.xlu0 %v549_v12, %s787_s22  ;;  %v458_v12 = vadd.f32 %v1122_v46, %v249_v11  ;;  %v253_v46 = vmul.f32 0.120078385, %v838_v63  ;;  %v255_v63 = vmul.f32 0.120078385, %v846_v35 }
 0x1a4   :  { %v416_v37 = vpop.permute.xlu0 %415 }
 0x1a5   :  { %v518_v32 = vpop.permute.xlu1 %517  ;;  %v459_v3 = vadd.f32 %v416_v37, %v250_v62  ;;  %v257_v62 = vmul.f32 0.120078385, %v854_v4 }
 0x1a6   :  { %v550_v15 = vadd.f32 %v518_v32, %v1061_v33 }
 0x1a8   :  { %693 = vrot.lane.b32.xlu1 %v550_v15, %s787_s22  ;;  %v420_v18 = vpop.permute.xlu0 %419 }
 0x1a9   :  { %v418_v43 = vpop.permute.xlu1 %417  ;;  %v461_v15 = vadd.f32 %v420_v18, %v252_v29 }
 0x1aa   :  { %v460_v36 = vadd.f32 %v418_v43, %v251_v14 }
 0x1ac   :  { %v1157_v57 = vpop.permute.xlu0 %423 }
 0x1ad   :  { %v1155_v48 = vpop.permute.xlu1 %421  ;;  %v463_v20 = vadd.f32 %v1157_v57, %v254_v50 }
 0x1ae   :  { %v462_v43 = vadd.f32 %v1155_v48, %v253_v46 }
 0x1b0   :  { %v1159_v23 = vpop.permute.xlu0 %427 }
 0x1b1   :  { %v1161_v58 = vpop.permute.xlu1 %425 }
 0x1b4   :  { %v1163_v0 = vpop.permute.xlu0 %431 }
 0x1b5   :  { %v1165_v28 = vpop.permute.xlu1 %429 }
 0x1b8   :  { %v1167_v2 = vpop.permute.xlu0 %435 }
 0x1b9   :  { %v1169_v33 = vpop.permute.xlu1 %433 }
 0x1bc   :  { %v584_v7 = vpop.permute.xlu0 %583 }
 0x1bd   :  { %v1171_v17 = vpop.permute.xlu1 %437  ;;  %v631_v59 = vadd.f32 %v584_v7, %v455_v13 }
 0x1c0   :  { %v588_v44 = vpop.permute.xlu0 %587 }
 0x1c1   :  { %v586_v22 = vpop.permute.xlu1 %585  ;;  %v633_v5 = vadd.f32 %v588_v44, %v457_v30  ;;  %v464_v30 = vadd.f32 %v1161_v58, %v255_v63 }
 0x1c2   :  { %v632_v8 = vadd.f32 %v586_v22, %v456_v42  ;;  %v259_v42 = vmul.f32 0.120078385, %v862_v38 }
 0x1c4   :  { %v592_v27 = vpop.permute.xlu0 %591 }
 0x1c5   :  { %v590_v31 = vpop.permute.xlu1 %589  ;;  %v635_v26 = vadd.f32 %v592_v27, %v459_v3  ;;  %v261_v3 = vmul.f32 0.120078385, %v870_v49 }
 0x1c6   :  { %v634_v7 = vadd.f32 %v590_v31, %v458_v12 }
 0x1c8   :  { %v596_v51 = vpop.permute.xlu0 %595 }
 0x1c9   :  { %v594_v56 = vpop.permute.xlu1 %593  ;;  %v637_v44 = vadd.f32 %v596_v51, %v461_v15 }
 0x1ca   :  { %v636_v54 = vadd.f32 %v594_v56, %v460_v36  ;;  %v256_v56 = vmul.f32 0.120078385, %v850_v53 }
 0x1cc   :  { %v600_v61 = vpop.permute.xlu0 %599  ;;  %v465_v35 = vadd.f32 %v1159_v23, %v256_v56 }
 0x1cd   :  { %v598_v1 = vpop.permute.xlu1 %597  ;;  %v639_v16 = vadd.f32 %v600_v61, %v463_v20  ;;  %v258_v61 = vmul.f32 0.120078385, %v858_v21 }
 0x1d0   :  { %v1173_v40 = vpop.permute.xlu0 %603 }
 0x1d1   :  { %v1175_v6 = vpop.permute.xlu1 %601  ;;  %v641_v58 = vadd.f32 %v1173_v40, %v465_v35  ;;  %v260_v40 = vmul.f32 0.120078385, %v866_v47 }
 0x1d2   :  { %v640_v53 = vadd.f32 %v1175_v6, %v464_v30  ;;  %v467_v6 = vadd.f32 %v1163_v0, %v258_v61 }
 0x1d4   :  { %v1177_v9 = vpop.permute.xlu0 %607 }
 0x1d5   :  { %v1179_v45 = vpop.permute.xlu1 %605  ;;  %v643_v38 = vadd.f32 %v1177_v9, %v467_v6 }
 0x1d8   :  { %v1182_v52 = vpop.permute.xlu0 %611 }
 0x1d9   :  { %v1186_v19 = vpop.permute.xlu1 %609 }
 0x1dd   :  { %v1191_v24 = vpop.permute.xlu1 %613 }
 0x1f6   :  { %v664_v25 = vpop.permute.xlu0 %663 }
 0x1f7   :  { %v711_v34 = vadd.f32 %v664_v25, %v631_v59  ;;  %v638_v59 = vadd.f32 %v598_v1, %v462_v43  ;;  %v466_v1 = vadd.f32 %v1165_v28, %v257_v62 }
 0x1f9   :  { %728 = vst.msk [vmem:[%s1288_s1] sm:$0xff] %vm727_vm1, %v711_v34  ;;  %v642_v11 = vadd.f32 %v1179_v45, %v466_v1  ;;  %v468_v45 = vadd.f32 %v1169_v33, %v259_v42 }
 0x1fa   :  { %v668_v55 = vpop.permute.xlu0 %667 }
 0x1fb   :  { %v713_v41 = vadd.f32 %v668_v55, %v633_v5  ;;  %v666_v39 = vpop.permute.xlu1 %665  ;;  %v644_v29 = vadd.f32 %v1186_v19, %v468_v45 }
 0x1fc   :  { %v712_v32 = vadd.f32 %v666_v39, %v632_v8  ;;  %v470_v8 = vadd.f32 %v1171_v17, %v261_v3 }
 0x1fd   :  { %731 = vst.msk [vmem:[%s1288_s1 + $0x10] sm:$0xff] %vm727_vm1, %v713_v41  ;;  %v469_v41 = vadd.f32 %v1167_v2, %v260_v40 }
 0x1fe   :  { %v672_v10 = vpop.permute.xlu0 %671  ;;  %730 = vst.msk [vmem:[%s1288_s1 + $0x8] sm:$0xf] %vm729_vm2, %v712_v32  ;;  %v646_v2 = vadd.f32 %v1191_v24, %v470_v8 }
 0x1ff   :  { %v715_v37 = vadd.f32 %v672_v10, %v635_v26  ;;  %v670_v22 = vpop.permute.xlu1 %669  ;;  %v645_v9 = vadd.f32 %v1182_v52, %v469_v41 }
 0x200   :  { %v714_v18 = vadd.f32 %v670_v22, %v634_v7 }
 0x201   :  { %733 = vst.msk [vmem:[%s1288_s1 + $0x20] sm:$0xff] %vm727_vm1, %v715_v37 }
 0x202   :  { %v676_v27 = vpop.permute.xlu0 %675  ;;  %732 = vst.msk [vmem:[%s1288_s1 + $0x18] sm:$0xf] %vm729_vm2, %v714_v18 }
 0x203   :  { %v717_v31 = vadd.f32 %v676_v27, %v637_v44  ;;  %v674_v51 = vpop.permute.xlu1 %673 }
 0x204   :  { %v716_v13 = vadd.f32 %v674_v51, %v636_v54 }
 0x205   :  { %735 = vst.msk [vmem:[%s1288_s1 + $0x30] sm:$0xff] %vm727_vm1, %v717_v31 }
 0x206   :  { %734 = vst.msk [vmem:[%s1288_s1 + $0x28] sm:$0xf] %vm729_vm2, %v716_v13  ;;  %v680_v57 = vpop.permute.xlu0 %679 }
 0x207   :  { %v678_v60 = vpop.permute.xlu1 %677  ;;  %v719_v25 = vadd.f32 %v680_v57, %v639_v16 }
 0x208   :  { %v718_v48 = vadd.f32 %v678_v60, %v638_v59 }
 0x209   :  { %737 = vst.msk [vmem:[%s1288_s1 + $0x40] sm:$0xff] %vm727_vm1, %v719_v25 }
 0x20a   :  { %736 = vst.msk [vmem:[%s1288_s1 + $0x38] sm:$0xf] %vm729_vm2, %v718_v48  ;;  %v684_v34 = vpop.permute.xlu0 %683 }
 0x20b   :  { %v682_v4 = vpop.permute.xlu1 %681  ;;  %v721_v5 = vadd.f32 %v684_v34, %v641_v58 }
 0x20c   :  { %v720_v23 = vadd.f32 %v682_v4, %v640_v53 }
 0x20d   :  { %739 = vst.msk [vmem:[%s1288_s1 + $0x50] sm:$0xff] %vm727_vm1, %v721_v5 }
 0x20e   :  { %738 = vst.msk [vmem:[%s1288_s1 + $0x48] sm:$0xf] %vm729_vm2, %v720_v23 }
 0x20f   :  { %v686_v21 = vpop.permute.xlu1 %685 }
 0x210   :  { %v722_v28 = vadd.f32 %v686_v21, %v642_v11  ;;  %v688_v55 = vpop.permute.xlu0 %687 }
 0x211   :  { %v723_v0 = vadd.f32 %v688_v55, %v643_v38 }
 0x212   :  { %740 = vst.msk [vmem:[%s1288_s1 + $0x58] sm:$0xf] %vm729_vm2, %v722_v28 }
 0x213   :  { %741 = vst.msk [vmem:[%s1288_s1 + $0x60] sm:$0xff] %vm727_vm1, %v723_v0 }
 0x215   :  { %v690_v47 = vpop.permute.xlu1 %689  ;;  %v692_v49 = vpop.permute.xlu0 %691 }
 0x216   :  { %v724_v33 = vadd.f32 %v690_v47, %v644_v29  ;;  %v725_v19 = vadd.f32 %v692_v49, %v645_v9 }
 0x218   :  { %742 = vst.msk [vmem:[%s1288_s1 + $0x68] sm:$0xf] %vm729_vm2, %v724_v33 }
 0x219   :  { %743 = vst.msk [vmem:[%s1288_s1 + $0x70] sm:$0xff] %vm727_vm1, %v725_v19 }
 0x21a   :  { %v694_v26 = vpop.permute.xlu1 %693 }
 0x21b   :  { %v726_v39 = vadd.f32 %v694_v26, %v646_v2 }
 0x21d   :  { %744 = vst.msk [vmem:[%s1288_s1 + $0x78] sm:$0xf] %vm729_vm2, %v726_v39 }
 0x21e   :  { %749 = vsyncpa [#allocation3], 1 }

</bundles_post_ra>
